<compile_context>
chip_gen: v5e
topology: v5e:2x2
jax: 0.10.0
libtpu: 0.0.40
codegen_flags: <defaults>
</compile_context>

<pallas_src>
import functools

import jax
import jax.numpy as jnp
from jax.experimental import pallas as pl
from jax.experimental.pallas import tpu as pltpu


def _proj_kernel(x_ref, w_ref, b_ref, o_ref):
    # x_ref: (C, HW_t)   w_ref: (OC, C)   b_ref: (OC, 1)   o_ref: (OC, HW_t)
    acc = jnp.dot(
        w_ref[...],
        x_ref[...],
        preferred_element_type=jnp.float32,
        precision=jax.lax.Precision.HIGHEST,
    )
    o_ref[...] = (acc + b_ref[...]).astype(o_ref.dtype)


def conv1x1_nchw_pallas(x_nchw, weight_oc_c, bias_oc):
    """Pointwise conv on NCHW input.

    x_nchw: (N, C, H, W), weight: (OC, C), bias: (OC,) -> (N, OC, H, W)
    """
    N, C, H, W = x_nchw.shape
    OC = weight_oc_c.shape[0]
    HW = H * W

    # Free row-major reshape: channels stay on the sublane axis, spatial
    # (H*W) becomes the 128-lane axis -> lane-dense loads and stores.
    x_flat = x_nchw.reshape(N, C, HW)
    bias2d = bias_oc.reshape(OC, 1).astype(jnp.float32)

    # Pick the largest legal lane tile (full H*W, or a multiple of 128) whose
    # double-buffered input+output tiles stay well under scoped VMEM on every
    # generation (v5e default 16 MiB, v7x physical 64 MiB).
    itemsize = jnp.dtype(x_nchw.dtype).itemsize
    budget_bytes = 8 * 1024 * 1024
    per_lane_bytes = 2 * (C + OC) * itemsize  # 2x = double buffering
    max_hw_tile = max(128, (budget_bytes // per_lane_bytes) // 128 * 128)

    if HW <= max_hw_tile:
        hw_tile = HW
        # With a single image, split H*W so v7x's 2 TensorCores both get work.
        if N == 1 and HW >= 256:
            hw_tile = min(hw_tile, -(-(HW // 2) // 128) * 128)
    else:
        hw_tile = max_hw_tile  # multiple of 128; last tile handled by masking

    grid = (N, pl.cdiv(HW, hw_tile))

    out_flat = pl.pallas_call(
        _proj_kernel,
        out_shape=jax.ShapeDtypeStruct((N, OC, HW), x_nchw.dtype),
        grid_spec=pltpu.PrefetchScalarGridSpec(
            num_scalar_prefetch=0,
            grid=grid,
            in_specs=[
                # `None` squeezes the batch dim out of the kernel ref.
                pl.BlockSpec((None, C, hw_tile), lambda n, t: (n, 0, t)),
                pl.BlockSpec((OC, C), lambda n, t: (0, 0)),   # resident weight
                pl.BlockSpec((OC, 1), lambda n, t: (0, 0)),   # resident bias
            ],
            out_specs=pl.BlockSpec((None, OC, hw_tile), lambda n, t: (n, 0, t)),
        ),
        compiler_params=pltpu.CompilerParams(
            # Both axes independent -> megacore-shards across v7x's 2 TCs.
            dimension_semantics=("parallel", "parallel"),
            # Raise the scoped-VMEM limit explicitly (v5e default is 16 MiB).
            vmem_limit_bytes=32 * 1024 * 1024,
        ),
    )(x_flat, weight_oc_c, bias2d)

    return out_flat.reshape(N, OC, H, W)


def pixel_shuffle(feat_nchw, factor):
    """PyTorch-semantics PixelShuffle: (N, C*r^2, H, W) -> (N, C, H*r, W*r)."""
    N, OC, H, W = feat_nchw.shape
    r = factor
    C = OC // (r * r)
    f = feat_nchw.reshape(N, C, r, r, H, W)
    f = jnp.transpose(f, (0, 1, 4, 2, 5, 3))  # (N, C, H, r, W, r)
    return f.reshape(N, C, H * r, W * r)


@functools.partial(jax.jit, static_argnames=("factor",))
def upsample_forward(x_nchw, weight_oc_c, bias_oc, factor):
    """Full UpSample forward.  x_nchw: (N, C, H, W) -> (N, C, H*r, W*r)."""
    feat = conv1x1_nchw_pallas(x_nchw, weight_oc_c, bias_oc)  # (N, OC, H, W)
    # TODO(synk): fusing PixelShuffle into the kernel's output store needs an
    # r-strided lane scatter that BlockSpec cannot express; it stays as one
    # XLA reshape/transpose pass here.
    return pixel_shuffle(feat, factor)


def upsample_reference(x, weight, bias, factor):
    """Plain-JAX reference: 1x1 conv (f32) + pixel shuffle."""
    feat = jnp.einsum(
        "nchw,oc->nohw", x, weight, precision=jax.lax.Precision.HIGHEST
    ) + bias[None, :, None, None]
    return pixel_shuffle(feat, factor)


def init_upsample_params(key, n_chan, factor):
    """Deterministic params matching the PyTorch module's shapes.

    proj.weight: (out_chan, n_chan, 1, 1), xavier_normal_(gain=1.0)
    proj.bias:   (out_chan,), PyTorch Conv2d default uniform(+-1/sqrt(fan_in))
    """
    out_chan = n_chan * factor * factor
    kw, kb = jax.random.split(key)
    fan_in = n_chan * 1 * 1
    fan_out = out_chan * 1 * 1
    std = (2.0 / (fan_in + fan_out)) ** 0.5  # xavier normal, gain=1.0
    weight = std * jax.random.normal(kw, (out_chan, n_chan), dtype=jnp.float32)
    bound = 1.0 / (fan_in ** 0.5)
    bias = jax.random.uniform(
        kb, (out_chan,), minval=-bound, maxval=bound, dtype=jnp.float32
    )
    return weight, bias


if __name__ == "__main__":
    key = jax.random.PRNGKey(0)
    k_x, k_p, k_x2, k_p2 = jax.random.split(key, 4)

    # Test 1: nominal small shape.
    N, C, H, W = 2, 4, 16, 16
    factor = 2
    x = jax.random.normal(k_x, (N, C, H, W), dtype=jnp.float32)
    weight, bias = init_upsample_params(k_p, C, factor)

    out = jax.block_until_ready(upsample_forward(x, weight, bias, factor))
    assert out.shape == (N, C, H * factor, W * factor), out.shape
    out_ref = upsample_reference(x, weight, bias, factor)
    assert jnp.allclose(out, out_ref, atol=1e-5, rtol=1e-5), (
        float(jnp.max(jnp.abs(out - out_ref)))
    )

    # Test 2: factor=3, non-square spatial, N=1 (exercises the H*W split and
    # the cdiv / masked-last-tile path).
    N2, C2, H2, W2, factor2 = 1, 8, 24, 20, 3
    x2 = jax.random.normal(k_x2, (N2, C2, H2, W2), dtype=jnp.float32)
    w2, b2 = init_upsample_params(k_p2, C2, factor2)
    out2 = jax.block_until_ready(upsample_forward(x2, w2, b2, factor2))
    assert out2.shape == (N2, C2, H2 * factor2, W2 * factor2), out2.shape
    out2_ref = upsample_reference(x2, w2, b2, factor2)
    assert jnp.allclose(out2, out2_ref, atol=1e-5, rtol=1e-5), (
        float(jnp.max(jnp.abs(out2 - out2_ref)))
    )

    print("KERNEL_OK")
</pallas_src>

<mosaic_0001>
module attributes {stable_mosaic.version = 11 : i64} {
  func.func @_proj_kernel(%arg0: i32, %arg1: i32, %arg2: memref<1x4x256xf32, #tpu.memory_space<vmem>>, %arg3: memref<16x4xf32, #tpu.memory_space<vmem>>, %arg4: memref<16x1xf32, #tpu.memory_space<vmem>>, %arg5: memref<1x16x256xf32, #tpu.memory_space<vmem>>) attributes {dimension_semantics = [#tpu.dimension_semantics<parallel>, #tpu.dimension_semantics<parallel>], iteration_bounds = array<i64: 2, 1>, scalar_prefetch = 0 : i64, scratch_operands = 0 : i64, tpu.core_type = #tpu.core_type<tc>, window_params = [{transform_indices = @transform_0, window_bounds = array<i64: 1, 4, 256>}, {pipeline_mode = #tpu.pipeline_mode<synchronous>, transform_indices = @transform_1, window_bounds = array<i64: 16, 4>}, {pipeline_mode = #tpu.pipeline_mode<synchronous>, transform_indices = @transform_2, window_bounds = array<i64: 16, 1>}, {transform_indices = @transform_3, window_bounds = array<i64: 1, 16, 256>}]} {
    %c0 = arith.constant 0 : index
    %c0_0 = arith.constant 0 : index
    %0 = vector.load %arg3[%c0, %c0_0] : memref<16x4xf32, #tpu.memory_space<vmem>>, vector<16x4xf32>
    %c0_1 = arith.constant 0 : index
    %c0_2 = arith.constant 0 : index
    %c0_3 = arith.constant 0 : index
    %1 = vector.load %arg2[%c0_1, %c0_2, %c0_3] : memref<1x4x256xf32, #tpu.memory_space<vmem>>, vector<1x4x256xf32>
    %2 = vector.shape_cast %1 : vector<1x4x256xf32> to vector<4x256xf32>
    %cst = arith.constant dense<0.000000e+00> : vector<16x256xf32>
    %3 = tpu.matmul %0, %2, %cst {dimension_numbers = #tpu.dot_dimension_numbers<[1], [0], [0], [1], [0, 0, 1, 1], [], []>, precision = #tpu.contract_precision<fp32>} : vector<16x4xf32>, vector<4x256xf32>, vector<16x256xf32> -> vector<16x256xf32>
    %c0_4 = arith.constant 0 : index
    %c0_5 = arith.constant 0 : index
    %4 = vector.load %arg4[%c0_4, %c0_5] : memref<16x1xf32, #tpu.memory_space<vmem>>, vector<16x1xf32>
    %5 = vector.broadcast %4 : vector<16x1xf32> to vector<16x256xf32>
    %6 = arith.addf %3, %5 : vector<16x256xf32>
    %c0_6 = arith.constant 0 : index
    %c0_7 = arith.constant 0 : index
    %c0_8 = arith.constant 0 : index
    %7 = vector.load %arg5[%c0_6, %c0_7, %c0_8] : memref<1x16x256xf32, #tpu.memory_space<vmem>>, vector<1x16x256xf32>
    %8 = vector.shape_cast %7 : vector<1x16x256xf32> to vector<16x256xf32>
    %9 = vector.shape_cast %6 : vector<16x256xf32> to vector<1x16x256xf32>
    tpu.vector_store %arg5[%c0_6, %c0_7, %c0_8], %9 {strides = array<i32>} : memref<1x16x256xf32, #tpu.memory_space<vmem>>, vector<1x16x256xf32>,
    return
  }
  func.func @transform_0(%arg0: i32, %arg1: i32) -> (i32, i32, i32) {
    %c0_i32 = arith.constant 0 : i32
    %c0_i32_0 = arith.constant 0 : i32
    return %arg0, %c0_i32, %arg1 : i32, i32, i32
  }
  func.func @transform_1(%arg0: i32, %arg1: i32) -> (i32, i32) {
    %c0_i32 = arith.constant 0 : i32
    %c0_i32_0 = arith.constant 0 : i32
    %c0_i32_1 = arith.constant 0 : i32
    return %c0_i32, %c0_i32_0 : i32, i32
  }
  func.func @transform_2(%arg0: i32, %arg1: i32) -> (i32, i32) {
    %c0_i32 = arith.constant 0 : i32
    %c0_i32_0 = arith.constant 0 : i32
    %c0_i32_1 = arith.constant 0 : i32
    return %c0_i32, %c0_i32_0 : i32, i32
  }
  func.func @transform_3(%arg0: i32, %arg1: i32) -> (i32, i32, i32) {
    %c0_i32 = arith.constant 0 : i32
    %c0_i32_0 = arith.constant 0 : i32
    return %arg0, %c0_i32, %arg1 : i32, i32, i32
  }
}

</mosaic_0001>

<bundles_post_ra>
// kernel: upsample_forward.1
= control target key start
LH: loop header
LB: loop body
LE: loop exit
PB: predicated region body
PF: predicated region fallthrough
CT: control target
= control target key end

     0   :  { %s770_s12 = smov 0   ;;  %s772_s13 = smov 0   ;;  %s834_s0 = inlined_call_operand.vmem [shape: f32[2,4,256], index: 0, kind: input, shape index: {}]   ;;  %s835_s1 = inlined_call_operand.vmem [shape: f32[16,4], index: 1, kind: input, shape index: {}]   ;;  %s836_s2 = inlined_call_operand.vmem [shape: f32[16,1], index: 2, kind: input, shape index: {}]   ;;  %s837_s3 = inlined_call_operand.vmem [shape: f32[2,16,256], index: 3, kind: output, shape index: {}]  }
   0x1   :  { %s774_s14 = smov 0  }
   0x2 LB: > { %s25_s15 = sadd.s32 1, %s743_s13  ;;  %p690_p0 = scmp.ge.s32.totalorder %s747_s14, 1  ;;  %s747_s14 = sphi %s774_s14, %s13_s14   ;;  %s743_s13 = sphi %s772_s13, %s839_s13   ;;  %s739_s12 = sphi %s770_s12, %s838_s12  }
   0x3   : > { %p27_p1 = scmp.ge.s32.totalorder %s25_s15, 2  ;;  %p158_p2 = scmp.lt.s32.totalorder %s747_s14, 3 }
   0x5   : > { %s841_s15 = smov (%p27_p1, %s25_s15), 0  ;;  %p159_p3 = pnand %p690_p0, %p158_p2 }
   0x6   : > { %p191_p4 = scmp.lt.s32.totalorder (!%p159_p3), %s739_s12, 1 }
   0x7   : > { %162 = sbr.rel (%p159_p3) target bundleno = 209 (0xd1), region = 32 }
   0xc   : > { %v210_v0 = vld [vmem:[%s835_s1] sm:$0xff]  ;;  %vm229_vm0 = vcmask 31744   ;;  %v211_v2 = vld [vmem:[%s835_s1 + $0x8] sm:$0xff]  ;;  %s843_s12 = smov (!%p191_p4, %s739_s12), 1  ;;  %v749_v4 = vmov 0   ;;  %vm236_vm1 = vcmask 1043456  }
   0xd   : > { %v231_v1 = vsel %vm229_vm0, %v210_v0, 0  ;;  %724 = vset.pattern.permute.xlu0 %v749_v4  ;;  %v213_v5 = vld [vmem:[%s836_s2] sm:$0xff]  ;;  %s697_s22 = sshll.u32 %s843_s12, 3  ;;  %v234_v7 = vsel %vm229_vm0, %v211_v2, 0  ;;  %v214_v13 = vld [vmem:[%s836_s2 + $0x8] sm:$0xff]  ;;  %s698_s28 = sshll.u32 %s843_s12, 5 }
   0xe   : > { %v796_v3 = vand.u32 4294901760, %v231_v1  ;;  %217 = vperm.xlu0 %724, %v213_v5   ;;  %s198_s25 = scalar_lea.vmem %s834_s0, %s697_s22  ;;  %v266_v10 = vand.u32 4294901760, %v234_v7  ;;  %s819_s4 = scalar_lea.vmem %s837_s3, %s698_s28 }
   0xf   : > { %v212_v8 = vld [vmem:[%s198_s25] sm:$0xff] }
  0x10   : > { %v259_v6 = vsub.f32 %v231_v1, %v796_v3  ;;  %226 = vst [vmem:[#allocation1] ss:$2 sm:$0xff] %v212_v8  ;;  %v267_v12 = vsub.f32 %v234_v7, %v266_v10 }
  0x12   : > { %v260_v9 = vand.u32 4294901760, %v259_v6  ;;  %v268_v19 = vand.u32 4294901760, %v267_v12 }
  0x14   : > { %v261_v11 = vsub.f32 %v259_v6, %v260_v9  ;;  %v269_v24 = vsub.f32 %v267_v12, %v268_v19 }
  0x16   : > { %222 = vperm.xlu0 %724, %v214_v13   ;;  %v262_v17 = vand.u32 4294901760, %v261_v11  ;;  %v270_v29 = vand.u32 4294901760, %v269_v24 }
  0x17   : > { %v227_v14 = vld.sshfl [vmem:[#allocation1] sm:$0xff pattern:$0x75316420]  ;;  %v228_v15 = vld.sshfl [vmem:[#allocation1 + $0x8] sm:$0xff pattern:$0x75316420] }
  0x18   : > { %v237_v16 = vsel %vm236_vm1, %v227_v14, 0  ;;  %v239_v18 = vsel %vm236_vm1, %v228_v15, 0 }
  0x19   : > { %v256_v20 = vand.u32 4294901760, %v237_v16  ;;  %v433_v21 = vand.u32 4294901760, %v239_v18 }
  0x1b   : > { %257 = vmatpush.msra.mxu0 %v256_v20  ;;  %v291_v22 = vsub.f32 %v237_v16, %v256_v20  ;;  %350 = vmatpush.msra.mxu3 %v256_v20  ;;  %v468_v23 = vsub.f32 %v239_v18, %v433_v21 }
  0x1c   : > { %263 = vmatmul.f32.vlgmr.msra.gmra.mxu0 %v262_v17  ;;  %354 = vmatmul.f32.vlgmr.msra.gmra.mxu3 %v260_v9 }
  0x1d   : > { %322 = vmatpush.msra.mxu2 %v291_v22  ;;  %v292_v25 = vand.u32 4294901760, %v291_v22  ;;  %v469_v26 = vand.u32 4294901760, %v468_v23 }
  0x1e   : > { %325 = vmatmul.f32.vlgmr.msra.gmra.mxu2 %v259_v6 }
  0x1f   : > { %434 = vmatpush.msrb.mxu2 %v433_v21  ;;  %v293_v27 = vsub.f32 %v291_v22, %v292_v25  ;;  %382 = vmatpush.msrb.mxu0 %v292_v25  ;;  %v470_v28 = vsub.f32 %v468_v23, %v469_v26 }
  0x21   : > { %559 = vmatpush.msra.mxu2 %v469_v26  ;;  %499 = vmatpush.msra.mxu0 %v468_v23  ;;  %v294_v30 = vand.u32 4294901760, %v293_v27  ;;  %v471_v31 = vand.u32 4294901760, %v470_v28 }
  0x23   : > { %295 = vmatpush.msra.mxu1 %v294_v30  ;;  %472 = vmatpush.msrb.mxu3 %v471_v31 }
  0x24   : > { %271 = vmatmul.f32.gmra.mxu0 %v270_v29  ;;  %297 = vmatmul.f32.vlgmr.msra.gmra.mxu1 %v796_v3 }
  0x25   : > { %408 = vmatpush.msrb.mxu1 %v256_v20  ;;  %360 = vmatmul.f32.gmra.mxu3 %v268_v19 }
  0x26   : > { %330 = vmatmul.f32.gmra.mxu2 %v267_v12  ;;  %585 = vmatpush.msra.mxu3 %v433_v21 }
  0x27   : > { %527 = vmatpush.msra.mxu1 %v433_v21 }
  0x2c   : > { %301 = vmatmul.f32.gmra.mxu1 %v266_v10  ;;  %384 = vmatmul.f32.vlgmr.msrb.gmra.mxu0 %v796_v3 }
  0x2d   : > { %474 = vmatmul.f32.vlgmr.msrb.gmra.mxu3 %v796_v3 }
  0x2e   : > { %440 = vmatmul.f32.vlgmr.msrb.gmra.mxu2 %v262_v17 }
  0x34   : > { %388 = vmatmul.f32.gmra.mxu0 %v266_v10  ;;  %410 = vmatmul.f32.vlgmr.msrb.gmra.mxu1 %v796_v3 }
  0x35   : > { %478 = vmatmul.f32.gmra.mxu3 %v266_v10 }
  0x36   : > { %448 = vmatmul.f32.gmra.mxu2 %v270_v29 }
  0x3c   : > { %414 = vmatmul.f32.gmra.mxu1 %v266_v10  ;;  %502 = vmatmul.f32.vlgmr.msra.gmra.mxu0 %v259_v6 }
  0x3d   : > { %587 = vmatmul.f32.vlgmr.msra.gmra.mxu3 %v796_v3 }
  0x3e   : > { %561 = vmatmul.f32.vlgmr.msra.gmra.mxu2 %v796_v3 }
  0x44   : > { %507 = vmatmul.f32.gmra.mxu0 %v267_v12  ;;  %531 = vmatmul.f32.vlgmr.msra.gmra.mxu1 %v260_v9 }
  0x45   : > { %591 = vmatmul.f32.gmra.mxu3 %v266_v10 }
  0x46   : > { %565 = vmatmul.f32.gmra.mxu2 %v266_v10 }
  0x4c   : > { %537 = vmatmul.f32.gmra.mxu1 %v268_v19 }
  0x80   : > { %v218_v33 = vpop.permute.xlu0 %217 }
  0x88   : > { %v223_v40 = vpop.permute.xlu0 %222 }
  0x99   : > { %v264_v32 = vpop.f32.mrf.mxu0 }
  0x9a   : > { %v265_v37 = vadd.f32 %v264_v32, %v218_v33 }
  0x9f   : > { %v355_v34 = vpop.f32.mrf.mxu3 }
  0xa1   : > { %v272_v35 = vpop.f32.mrf.mxu0  ;;  %v298_v36 = vpop.f32.mrf.mxu1 }
  0xa2   : > { %v326_v38 = vpop.f32.mrf.mxu2  ;;  %v299_v39 = vadd.f32 %v298_v36, %v265_v37  ;;  %v273_v45 = vadd.f32 %v272_v35, %v223_v40 }
  0xa4   : > { %v327_v44 = vadd.f32 %v326_v38, %v299_v39 }
  0xa6   : > { %v356_v47 = vadd.f32 %v355_v34, %v327_v44 }
  0xa8   : > { %v361_v41 = vpop.f32.mrf.mxu3 }
  0xa9   : > { %v302_v42 = vpop.f32.mrf.mxu1  ;;  %v385_v43 = vpop.f32.mrf.mxu0 }
  0xaa   : > { %v331_v46 = vpop.f32.mrf.mxu2  ;;  %v303_v48 = vadd.f32 %v302_v42, %v273_v45  ;;  %v386_v49 = vadd.f32 %v385_v43, %v356_v47 }
  0xac   : > { %v332_v53 = vadd.f32 %v331_v46, %v303_v48 }
  0xae   : > { %v362_v56 = vadd.f32 %v361_v41, %v332_v53 }
  0xb0   : > { %v475_v50 = vpop.f32.mrf.mxu3 }
  0xb1   : > { %v389_v51 = vpop.f32.mrf.mxu0  ;;  %v411_v52 = vpop.f32.mrf.mxu1 }
  0xb2   : > { %v412_v54 = vadd.f32 %v411_v52, %v386_v49  ;;  %v441_v55 = vpop.f32.mrf.mxu2  ;;  %v390_v57 = vadd.f32 %v389_v51, %v362_v56 }
  0xb3   : > { %v442_v60 = vadd.f32 %v441_v55, %v218_v33 }
  0xb4   : > { %595 = vst [vmem:[%s819_s4] sm:$0xff] %v412_v54 }
  0xb5   : > { %v476_v0 = vadd.f32 %v475_v50, %v442_v60 }
  0xb8   : > { %v479_v58 = vpop.f32.mrf.mxu3 }
  0xb9   : > { %v415_v59 = vpop.f32.mrf.mxu1  ;;  %v503_v63 = vpop.f32.mrf.mxu0 }
  0xba   : > { %v416_v61 = vadd.f32 %v415_v59, %v390_v57  ;;  %v449_v62 = vpop.f32.mrf.mxu2  ;;  %v504_v1 = vadd.f32 %v503_v63, %v476_v0 }
  0xbb   : > { %v450_v4 = vadd.f32 %v449_v62, %v223_v40 }
  0xbc   : > { %597 = vst [vmem:[%s819_s4 + $0x10] sm:$0xff] %v416_v61 }
  0xbd   : > { %v480_v9 = vadd.f32 %v479_v58, %v450_v4 }
  0xc0   : > { %v588_v3 = vpop.f32.mrf.mxu3 }
  0xc1   : > { %v532_v2 = vpop.f32.mrf.mxu1  ;;  %v508_v8 = vpop.f32.mrf.mxu0 }
  0xc2   : > { %v533_v5 = vadd.f32 %v532_v2, %v504_v1  ;;  %v562_v6 = vpop.f32.mrf.mxu2  ;;  %v509_v11 = vadd.f32 %v508_v8, %v480_v9 }
  0xc4   : > { %v563_v7 = vadd.f32 %v562_v6, %v533_v5 }
  0xc6   : > { %v589_v10 = vadd.f32 %v588_v3, %v563_v7 }
  0xc8   : > { %596 = vst [vmem:[%s819_s4 + $0x8] sm:$0xff] %v589_v10  ;;  %v592_v15 = vpop.f32.mrf.mxu3 }
  0xc9   : > { %v538_v12 = vpop.f32.mrf.mxu1 }
  0xca   : > { %v539_v13 = vadd.f32 %v538_v12, %v509_v11  ;;  %v566_v14 = vpop.f32.mrf.mxu2 }
  0xcc   : > { %v567_v16 = vadd.f32 %v566_v14, %v539_v13 }
  0xce   : > { %v593_v17 = vadd.f32 %v592_v15, %v567_v16 }
  0xd0   : > { %598 = vst [vmem:[%s819_s4 + $0x18] sm:$0xff] %v593_v17 }
  0xd1 PF: > { %s13_s14 = sadd.s32 1, %s747_s14   ;;  %s838_s12 = smov %s743_s13 }
  0xd2   : > { %p10_p5 = scmp.ge.s32.totalorder %s13_s14, 4   ;;  %s839_s13 = smov %s841_s15 }
  0xd4   :  { %12 = sbr.rel (!%p10_p5) target bundleno = 2 (0x2), region = 62 }

</bundles_post_ra>
